<compile_context>
chip_gen: v7x
topology: tpu7x:2x2x1
jax: 0.10.0
libtpu: 0.0.40
codegen_flags: <defaults>
</compile_context>

<pallas_src>
import functools

import jax
import jax.numpy as jnp
from jax.experimental import pallas as pl
from jax.experimental.pallas import tpu as pltpu


def gradcam_kernel(x_ref, wf_ref, wl_ref, b_ref, o_ref, *, n, hw):
    # x_ref:  (N*HW, C_in)      all batch rows, batch*spatial dense on sublanes
    # wf_ref: (C_in, CF_PAD)    synthetic featMod 1x1-conv weight (lane-padded)
    # wl_ref: (CF_PAD, NCLS_P)  head weight, zero-padded rows/lanes
    # b_ref:  (1, NCLS_P)       head bias, zero-padded lanes
    # o_ref:  (N, NCLS_P)       lane-dense logits slab

    # featMod stub: pointwise conv over channels + ReLU  -> (N*HW, CF_PAD)
    feat = jnp.maximum(
        jnp.dot(x_ref[...], wf_ref[...], preferred_element_type=jnp.float32),
        0.0)

    # adaptive_avg_pool2d(feat, (1,1)) + view: per-batch mean over the HW
    # entries.  The reshape splits the sublane axis at a multiple of 8
    # (tile-aligned, no copy); the sum is a sublane reduction on the XLU.
    pooled = jnp.sum(feat.reshape(n, hw, feat.shape[-1]), axis=1) * (1.0 / hw)

    # classificationHead.linLay: pooled @ W^T + b  -> (N, NCLS_P)
    logits = jnp.dot(pooled, wl_ref[...],
                     preferred_element_type=jnp.float32) + b_ref[...]
    o_ref[...] = logits.astype(o_ref.dtype)


def gradcam_forward(x_nchw, w_feat, w_lin_t, b_lin):
    """x_nchw: (N, C_in, H, W) float32. Returns (N, num_classes) float32."""
    N, C_in, H, W = x_nchw.shape
    HW = H * W
    C_feat = w_feat.shape[1]
    n_cls = w_lin_t.shape[1]
    cf_pad = pl.cdiv(C_feat, 128) * 128            # lane-dense feature width
    n_cls_pad = pl.cdiv(n_cls, 128) * 128          # lane-dense output width

    # NCHW -> (N*HW, C_in): batch*spatial dense on sublanes, channels on lanes.
    x2d = jnp.transpose(x_nchw, (0, 2, 3, 1)).reshape(N * HW, C_in)

    # Zero-pad weights to 128-lane-dense slabs.  Correctness is preserved:
    # relu(x @ 0) = 0 in the padded feature channels, and the padded head rows
    # are zero, so padded channels/classes contribute nothing.
    wf_pad = jnp.zeros((C_in, cf_pad), jnp.float32).at[:, :C_feat].set(w_feat)
    wl_pad = (jnp.zeros((cf_pad, n_cls_pad), jnp.float32)
              .at[:C_feat, :n_cls].set(w_lin_t))
    b_pad = jnp.zeros((1, n_cls_pad), jnp.float32).at[0, :n_cls].set(b_lin)

    kernel = functools.partial(gradcam_kernel, n=N, hw=HW)

    out = pl.pallas_call(
        kernel,
        out_shape=jax.ShapeDtypeStruct((N, n_cls_pad), jnp.float32),
        grid_spec=pltpu.PrefetchScalarGridSpec(
            num_scalar_prefetch=0,
            grid=(1,),                              # fully collapsed batch grid
            in_specs=[
                pl.BlockSpec((N * HW, C_in), lambda i: (0, 0)),
                pl.BlockSpec((C_in, cf_pad), lambda i: (0, 0)),
                pl.BlockSpec((cf_pad, n_cls_pad), lambda i: (0, 0)),
                pl.BlockSpec((1, n_cls_pad), lambda i: (0, 0)),
            ],
            out_specs=pl.BlockSpec((N, n_cls_pad), lambda i: (0, 0)),
        ),
        compiler_params=pltpu.CompilerParams(
            dimension_semantics=("arbitrary",)),
    )(x2d, wf_pad, wl_pad, b_pad)

    return out[:, :n_cls]                           # slice padded lanes back off


def gradcam_reference(x_nchw, w_feat, w_lin_t, b_lin):
    """Pure-JAX reference with identical semantics to the PyTorch module."""
    N, C_in, H, W = x_nchw.shape
    x_flat = jnp.transpose(x_nchw, (0, 2, 3, 1)).reshape(N, H * W, C_in)
    feat = jnp.maximum(jnp.einsum('nsc,cf->nsf', x_flat, w_feat), 0.0)
    pooled = jnp.mean(feat, axis=1)                 # == adaptive_avg_pool2d + view
    return pooled @ w_lin_t + b_lin[None, :]        # (N, num_classes)


if __name__ == "__main__":
    # Small shapes consistent with the forward pass.
    N, C_in, H, W = 2, 4, 16, 16
    C_feat, n_cls = 32, 10

    key = jax.random.PRNGKey(0)
    kx, kwf, kwl, kb = jax.random.split(key, 4)

    x = jax.random.normal(kx, (N, C_in, H, W), dtype=jnp.float32)
    # Deterministic synthetic parameters (no checkpoint loading).
    w_feat = jax.random.normal(kwf, (C_in, C_feat), dtype=jnp.float32) * 0.1
    # torch.nn.Linear stores weight as (out, in); we keep it pre-transposed (in, out).
    w_lin_t = jax.random.normal(kwl, (C_feat, n_cls), dtype=jnp.float32) * 0.1
    b_lin = jax.random.normal(kb, (n_cls,), dtype=jnp.float32) * 0.1

    out = jax.block_until_ready(gradcam_forward(x, w_feat, w_lin_t, b_lin))
    ref = jax.block_until_ready(gradcam_reference(x, w_feat, w_lin_t, b_lin))

    assert out.shape == (N, n_cls), out.shape
    assert jnp.allclose(out, ref, atol=2e-5, rtol=1e-5), (out, ref)
    print("KERNEL_OK")
</pallas_src>

<mosaic_0001>
module attributes {stable_mosaic.version = 11 : i64} {
  func.func @gradcam_kernel(%arg0: i32, %arg1: memref<512x4xf32, #tpu.memory_space<vmem>>, %arg2: memref<4x128xf32, #tpu.memory_space<vmem>>, %arg3: memref<128x128xf32, #tpu.memory_space<vmem>>, %arg4: memref<1x128xf32, #tpu.memory_space<vmem>>, %arg5: memref<2x128xf32, #tpu.memory_space<vmem>>) attributes {dimension_semantics = [#tpu.dimension_semantics<arbitrary>], iteration_bounds = array<i64: 1>, scalar_prefetch = 0 : i64, scratch_operands = 0 : i64, tpu.core_type = #tpu.core_type<tc>, window_params = [{pipeline_mode = #tpu.pipeline_mode<synchronous>, transform_indices = @transform_0, window_bounds = array<i64: 512, 4>}, {pipeline_mode = #tpu.pipeline_mode<synchronous>, transform_indices = @transform_1, window_bounds = array<i64: 4, 128>}, {pipeline_mode = #tpu.pipeline_mode<synchronous>, transform_indices = @transform_2, window_bounds = array<i64: 128, 128>}, {pipeline_mode = #tpu.pipeline_mode<synchronous>, transform_indices = @transform_3, window_bounds = array<i64: 1, 128>}, {pipeline_mode = #tpu.pipeline_mode<synchronous>, transform_indices = @transform_4, window_bounds = array<i64: 2, 128>}]} {
    %c0 = arith.constant 0 : index
    %c0_0 = arith.constant 0 : index
    %0 = vector.load %arg1[%c0, %c0_0] : memref<512x4xf32, #tpu.memory_space<vmem>>, vector<512x4xf32>
    %c0_1 = arith.constant 0 : index
    %c0_2 = arith.constant 0 : index
    %1 = vector.load %arg2[%c0_1, %c0_2] : memref<4x128xf32, #tpu.memory_space<vmem>>, vector<4x128xf32>
    %cst = arith.constant dense<0.000000e+00> : vector<512x128xf32>
    %2 = tpu.matmul %0, %1, %cst {dimension_numbers = #tpu.dot_dimension_numbers<[1], [0], [0], [1], [0, 0, 1, 1], [], []>} : vector<512x4xf32>, vector<4x128xf32>, vector<512x128xf32> -> vector<512x128xf32>
    %cst_3 = arith.constant 0.000000e+00 : f32
    %3 = vector.broadcast %cst_3 : f32 to vector<512x128xf32>
    %4 = arith.maximumf %2, %3 : vector<512x128xf32>
    %5 = vector.shape_cast %4 : vector<512x128xf32> to vector<2x256x128xf32>
    %cst_4 = arith.constant dense<0.000000e+00> : vector<2x128xf32>
    %6 = vector.multi_reduction <add>, %5, %cst_4 [1] : vector<2x256x128xf32> to vector<2x128xf32>
    %cst_5 = arith.constant 3.906250e-03 : f32
    %7 = vector.broadcast %cst_5 : f32 to vector<2x128xf32>
    %8 = arith.mulf %6, %7 : vector<2x128xf32>
    %c0_6 = arith.constant 0 : index
    %c0_7 = arith.constant 0 : index
    %9 = vector.load %arg3[%c0_6, %c0_7] : memref<128x128xf32, #tpu.memory_space<vmem>>, vector<128x128xf32>
    %cst_8 = arith.constant dense<0.000000e+00> : vector<2x128xf32>
    %10 = tpu.matmul %8, %9, %cst_8 {dimension_numbers = #tpu.dot_dimension_numbers<[1], [0], [0], [1], [0, 0, 1, 1], [], []>} : vector<2x128xf32>, vector<128x128xf32>, vector<2x128xf32> -> vector<2x128xf32>
    %c0_9 = arith.constant 0 : index
    %c0_10 = arith.constant 0 : index
    %11 = vector.load %arg4[%c0_9, %c0_10] : memref<1x128xf32, #tpu.memory_space<vmem>>, vector<1x128xf32>
    %12 = vector.broadcast %11 : vector<1x128xf32> to vector<2x128xf32>
    %13 = arith.addf %10, %12 : vector<2x128xf32>
    %c0_11 = arith.constant 0 : index
    %c0_12 = arith.constant 0 : index
    %14 = vector.load %arg5[%c0_11, %c0_12] : memref<2x128xf32, #tpu.memory_space<vmem>>, vector<2x128xf32>
    tpu.vector_store %arg5[%c0_11, %c0_12], %13 {strides = array<i32>} : memref<2x128xf32, #tpu.memory_space<vmem>>, vector<2x128xf32>,
    return
  }
  func.func @transform_0(%arg0: i32) -> (i32, i32) {
    %c0_i32 = arith.constant 0 : i32
    %c0_i32_0 = arith.constant 0 : i32
    %c0_i32_1 = arith.constant 0 : i32
    return %c0_i32, %c0_i32_0 : i32, i32
  }
  func.func @transform_1(%arg0: i32) -> (i32, i32) {
    %c0_i32 = arith.constant 0 : i32
    %c0_i32_0 = arith.constant 0 : i32
    %c0_i32_1 = arith.constant 0 : i32
    return %c0_i32, %c0_i32_0 : i32, i32
  }
  func.func @transform_2(%arg0: i32) -> (i32, i32) {
    %c0_i32 = arith.constant 0 : i32
    %c0_i32_0 = arith.constant 0 : i32
    %c0_i32_1 = arith.constant 0 : i32
    return %c0_i32, %c0_i32_0 : i32, i32
  }
  func.func @transform_3(%arg0: i32) -> (i32, i32) {
    %c0_i32 = arith.constant 0 : i32
    %c0_i32_0 = arith.constant 0 : i32
    %c0_i32_1 = arith.constant 0 : i32
    return %c0_i32, %c0_i32_0 : i32, i32
  }
  func.func @transform_4(%arg0: i32) -> (i32, i32) {
    %c0_i32 = arith.constant 0 : i32
    %c0_i32_0 = arith.constant 0 : i32
    %c0_i32_1 = arith.constant 0 : i32
    return %c0_i32, %c0_i32_0 : i32, i32
  }
}

</mosaic_0001>

<bundles_post_ra>
// kernel: tpu_custom_call.1
= control target key start
LH: loop header
LB: loop body
LE: loop exit
PB: predicated region body
PF: predicated region fallthrough
CT: control target
= control target key end

     0   :  { %vm276_vm0 = vcmask 1043456   ;;  %vm83_vm1 = vcmask 31744   ;;  %s1694_s0 = inlined_call_operand.vmem [shape: f32[512,4], index: 0, kind: input, shape index: {}]   ;;  %s1695_s1 = inlined_call_operand.vmem [shape: f32[4,128], index: 1, kind: input, shape index: {}]   ;;  %s1696_s2 = inlined_call_operand.vmem [shape: f32[128,128], index: 2, kind: input, shape index: {}]   ;;  %s1697_s3 = inlined_call_operand.vmem [shape: f32[1,128], index: 3, kind: input, shape index: {}]   ;;  %s1698_s4 = inlined_call_operand.hbm [shape: f32[2,128], index: 4, kind: output, shape index: {}]  }
   0x1   :  { %v82_v0 = vld [vmem:[%s1695_s1] sm:$0xf]  ;;  %v19_v2 = vld [vmem:[%s1694_s0 + $0x8] sm:$0xff]  ;;  %v20_v3 = vld [vmem:[%s1694_s0 + $0x10] sm:$0xff] }
   0x2   :  { %v18_v1 = vld [vmem:[%s1694_s0] sm:$0xff]  ;;  %1066 = vmatprep.subr.msk.mxu0 %vm276_vm0, %v82_v0  ;;  %1223 = vmatprep.subr.msk.mxu1 %vm276_vm0, %v82_v0  ;;  %v21_v4 = vld [vmem:[%s1694_s0 + $0x18] sm:$0xff]  ;;  %v23_v6 = vld [vmem:[%s1694_s0 + $0x28] sm:$0xff] }
   0x3   :  { %1068 = vmatprep.mubr.msk.f32.mxu0 %vm83_vm1, %v18_v1  ;;  %1067 = vmatpush3.msk.msra.mxu0 %vm276_vm0, %v82_v0  ;;  %v22_v5 = vld [vmem:[%s1694_s0 + $0x20] sm:$0xff]  ;;  %v24_v7 = vld [vmem:[%s1694_s0 + $0x30] sm:$0xff]  ;;  %v25_v9 = vld [vmem:[%s1694_s0 + $0x38] sm:$0xff] }
   0x4   :  { %1069 = vmatmul.mubr.msk.f32.vlgmr.msra.gmra.mrb[0].mxu0 %vm83_vm1, %v19_v2  ;;  %1224 = vmatpush3.msk.msra.mxu1 %vm276_vm0, %v82_v0  ;;  %v52_v8 = vld [vmem:[%s1694_s0 + $0x110] sm:$0xff]  ;;  %v53_v10 = vld [vmem:[%s1694_s0 + $0x118] sm:$0xff]  ;;  %v54_v11 = vld [vmem:[%s1694_s0 + $0x120] sm:$0xff] }
   0x5   :  { %1071 = vmatprep.mubr.msk.f32.mxu0 %vm83_vm1, %v20_v3  ;;  %1119 = vmatprep.mubr.msk.f32.mxu1 %vm83_vm1, %v52_v8  ;;  %v26_v12 = vld [vmem:[%s1694_s0 + $0x40] sm:$0xff]  ;;  %v55_v13 = vld [vmem:[%s1694_s0 + $0x128] sm:$0xff]  ;;  %v56_v14 = vld [vmem:[%s1694_s0 + $0x130] sm:$0xff] }
   0x6   :  { %1120 = vmatmul.mubr.msk.f32.vlgmr.msra.gmra.mrb[0].mxu1 %vm83_vm1, %v53_v10  ;;  %v27_v15 = vld [vmem:[%s1694_s0 + $0x48] sm:$0xff]  ;;  %v28_v16 = vld [vmem:[%s1694_s0 + $0x50] sm:$0xff]  ;;  %v57_v17 = vld [vmem:[%s1694_s0 + $0x138] sm:$0xff] }
   0x7   :  { %1122 = vmatprep.mubr.msk.f32.mxu1 %vm83_vm1, %v54_v11  ;;  %v58_v18 = vld [vmem:[%s1694_s0 + $0x140] sm:$0xff]  ;;  %v29_v19 = vld [vmem:[%s1694_s0 + $0x58] sm:$0xff] }
   0x8   :  { %1072 = vmatmul.mubr.msk.f32.gmra.mrb[2].mxu0 %vm83_vm1, %v21_v4  ;;  %v30_v20 = vld [vmem:[%s1694_s0 + $0x60] sm:$0xff] }
   0x9   :  { %1074 = vmatprep.mubr.msk.f32.mxu0 %vm83_vm1, %v22_v5 }
   0xa   :  { %1123 = vmatmul.mubr.msk.f32.gmra.mrb[2].mxu1 %vm83_vm1, %v55_v13 }
   0xb   :  { %1125 = vmatprep.mubr.msk.f32.mxu1 %vm83_vm1, %v56_v14 }
   0xc   :  { %1075 = vmatmul.mubr.msk.f32.gmra.mrb[4].mxu0 %vm83_vm1, %v23_v6 }
   0xd   :  { %1077 = vmatprep.mubr.msk.f32.mxu0 %vm83_vm1, %v24_v7 }
   0xe   :  { %1126 = vmatmul.mubr.msk.f32.gmra.mrb[4].mxu1 %vm83_vm1, %v57_v17 }
  0x10   :  { %1078 = vmatmul.mubr.msk.f32.gmra.mrb[6].mxu0 %vm83_vm1, %v25_v9 }
  0x11   :  { %1080 = vmatprep.mubr.msk.f32.mxu0 %vm83_vm1, %v26_v12 }
  0x14   :  { %1081 = vmatmul.mubr.msk.f32.gmra.mrb[8].mxu0 %vm83_vm1, %v27_v15 }
  0x15   :  { %1083 = vmatprep.mubr.msk.f32.mxu0 %vm83_vm1, %v28_v16 }
  0x16   :  { %9 = vsyncpa [#allocation3], 0  ;;  %1128 = vmatprep.mubr.msk.f32.mxu1 %vm83_vm1, %v58_v18  ;;  %v59_v21 = vld [vmem:[%s1694_s0 + $0x148] sm:$0xff]  ;;  %v60_v22 = vld [vmem:[%s1694_s0 + $0x150] sm:$0xff]  ;;  %v1253_v3 = vmov 0.0|0.0   ;;  %vm1254_vm2 = vmmov 0  }
  0x17   :  { %v31_v23 = vld [vmem:[%s1694_s0 + $0x68] sm:$0xff]  ;;  %v32_v24 = vld [vmem:[%s1694_s0 + $0x70] sm:$0xff]  ;;  %1129 = vmatmul.mubr.msk.f32.gmra.mrb[6].mxu1 %vm83_vm1, %v59_v21  ;;  %v61_v25 = vld [vmem:[%s1694_s0 + $0x158] sm:$0xff]  ;;  %1199 = vmatprep.subr.bf16.mxu1 %v1253_v3  ;;  %vm830_vm3 = vcmask 1041409   ;;  %s1256_s15 = smov [#allocation2]  }
  0x18   :  { %1084 = vmatmul.mubr.msk.f32.gmra.mrb[10].mxu0 %vm83_vm1, %v29_v19  ;;  %1131 = vmatprep.mubr.msk.f32.mxu1 %vm83_vm1, %v60_v22  ;;  %v62_v26 = vld [vmem:[%s1694_s0 + $0x160] sm:$0xff]  ;;  %v33_v27 = vld [vmem:[%s1694_s0 + $0x78] sm:$0xff]  ;;  %v63_v29 = vld [vmem:[%s1694_s0 + $0x168] sm:$0xff] }
  0x19   :  { %1086 = vmatprep.mubr.msk.f32.mxu0 %vm83_vm1, %v30_v20  ;;  %v34_v28 = vld [vmem:[%s1694_s0 + $0x80] sm:$0xff]  ;;  %v64_v30 = vld [vmem:[%s1694_s0 + $0x170] sm:$0xff]  ;;  %v35_v31 = vld [vmem:[%s1694_s0 + $0x88] sm:$0xff] }
  0x1a   :  { %v36_v32 = vld [vmem:[%s1694_s0 + $0x90] sm:$0xff]  ;;  %v65_v33 = vld [vmem:[%s1694_s0 + $0x178] sm:$0xff]  ;;  %v66_v34 = vld [vmem:[%s1694_s0 + $0x180] sm:$0xff] }
  0x1b   :  { %1132 = vmatmul.mubr.msk.f32.gmra.mrb[8].mxu1 %vm83_vm1, %v61_v25  ;;  %v37_v35 = vld [vmem:[%s1694_s0 + $0x98] sm:$0xff]  ;;  %v38_v36 = vld [vmem:[%s1694_s0 + $0xa0] sm:$0xff]  ;;  %v67_v37 = vld [vmem:[%s1694_s0 + $0x188] sm:$0xff] }
  0x1c   :  { %1087 = vmatmul.mubr.msk.f32.gmra.mrb[12].mxu0 %vm83_vm1, %v31_v23  ;;  %1134 = vmatprep.mubr.msk.f32.mxu1 %vm83_vm1, %v62_v26  ;;  %v68_v38 = vld [vmem:[%s1694_s0 + $0x190] sm:$0xff]  ;;  %v39_v39 = vld [vmem:[%s1694_s0 + $0xa8] sm:$0xff]  ;;  %v69_v41 = vld [vmem:[%s1694_s0 + $0x198] sm:$0xff] }
  0x1d   :  { %1089 = vmatprep.mubr.msk.f32.mxu0 %vm83_vm1, %v32_v24  ;;  %v40_v40 = vld [vmem:[%s1694_s0 + $0xb0] sm:$0xff]  ;;  %v70_v42 = vld [vmem:[%s1694_s0 + $0x1a0] sm:$0xff]  ;;  %v41_v43 = vld [vmem:[%s1694_s0 + $0xb8] sm:$0xff] }
  0x1e   :  { %v42_v44 = vld [vmem:[%s1694_s0 + $0xc0] sm:$0xff]  ;;  %v71_v45 = vld [vmem:[%s1694_s0 + $0x1a8] sm:$0xff]  ;;  %v72_v46 = vld [vmem:[%s1694_s0 + $0x1b0] sm:$0xff] }
  0x1f   :  { %1135 = vmatmul.mubr.msk.f32.gmra.mrb[10].mxu1 %vm83_vm1, %v63_v29  ;;  %v43_v47 = vld [vmem:[%s1694_s0 + $0xc8] sm:$0xff]  ;;  %v44_v48 = vld [vmem:[%s1694_s0 + $0xd0] sm:$0xff]  ;;  %v73_v49 = vld [vmem:[%s1694_s0 + $0x1b8] sm:$0xff] }
  0x20   :  { %1090 = vmatmul.mubr.msk.f32.gmra.mrb[14].mxu0 %vm83_vm1, %v33_v27  ;;  %1137 = vmatprep.mubr.msk.f32.mxu1 %vm83_vm1, %v64_v30  ;;  %v74_v50 = vld [vmem:[%s1694_s0 + $0x1c0] sm:$0xff]  ;;  %v45_v51 = vld [vmem:[%s1694_s0 + $0xd8] sm:$0xff]  ;;  %v75_v53 = vld [vmem:[%s1694_s0 + $0x1c8] sm:$0xff] }
  0x21   :  { %1092 = vmatprep.mubr.msk.f32.mxu0 %vm83_vm1, %v34_v28  ;;  %v46_v52 = vld [vmem:[%s1694_s0 + $0xe0] sm:$0xff]  ;;  %v76_v54 = vld [vmem:[%s1694_s0 + $0x1d0] sm:$0xff]  ;;  %v47_v55 = vld [vmem:[%s1694_s0 + $0xe8] sm:$0xff] }
  0x22   :  { %v48_v56 = vld [vmem:[%s1694_s0 + $0xf0] sm:$0xff]  ;;  %v77_v57 = vld [vmem:[%s1694_s0 + $0x1d8] sm:$0xff]  ;;  %v78_v58 = vld [vmem:[%s1694_s0 + $0x1e0] sm:$0xff] }
  0x23   :  { %1138 = vmatmul.mubr.msk.f32.gmra.mrb[12].mxu1 %vm83_vm1, %v65_v33  ;;  %v49_v59 = vld [vmem:[%s1694_s0 + $0xf8] sm:$0xff]  ;;  %v50_v60 = vld [vmem:[%s1694_s0 + $0x100] sm:$0xff]  ;;  %v79_v61 = vld [vmem:[%s1694_s0 + $0x1e8] sm:$0xff] }
  0x24   :  { %1093 = vmatmul.mubr.msk.f32.gmra.mrb[16].mxu0 %vm83_vm1, %v35_v31  ;;  %1140 = vmatprep.mubr.msk.f32.mxu1 %vm83_vm1, %v66_v34  ;;  %v80_v62 = vld [vmem:[%s1694_s0 + $0x1f0] sm:$0xff]  ;;  %v51_v63 = vld [vmem:[%s1694_s0 + $0x108] sm:$0xff]  ;;  %v81_v0 = vld [vmem:[%s1694_s0 + $0x1f8] sm:$0xff]  ;;  %s910_s0 = sshll.u32 %s1256_s15, 4  ;;  %s911_s0 = int_to_ptr.vmem [resolvable:$true] %s910_s0 }
  0x25   :  { %1095 = vmatprep.mubr.msk.f32.mxu0 %vm83_vm1, %v36_v32  ;;  %v805_v1 = vld [vmem:[%s1696_s2] sm:$0xff]  ;;  %v806_v2 = vld [vmem:[%s1696_s2 + $0x8] sm:$0xff]  ;;  %v807_v5 = vld [vmem:[%s1696_s2 + $0x10] sm:$0xff]  ;;  %s1229_s16 = scalar_lea.vmem %s911_s0, 32  ;;  %p1234_p1 = scmp.lt.s32.totalorder %s911_s0, %s911_s0 }
  0x26   :  { %v1200_v4 = vpack.c.bf16 %v806_v2, %v805_v1  ;;  %v808_v6 = vld [vmem:[%s1696_s2 + $0x18] sm:$0xff]  ;;  %v809_v8 = vld [vmem:[%s1696_s2 + $0x20] sm:$0xff]  ;;  %v810_v9 = vld [vmem:[%s1696_s2 + $0x28] sm:$0xff]  ;;  %p1230_p0 = scmp.ne.s32.totalorder %s911_s0, %s1229_s16  ;;  %p1235_p2 = scmp.lt.s32.totalorder %s1229_s16, %s1229_s16 }
  0x27   :  { %1141 = vmatmul.mubr.msk.f32.gmra.mrb[14].mxu1 %vm83_vm1, %v67_v37  ;;  %v1203_v7 = vpack.c.bf16 %v808_v6, %v807_v5  ;;  %v1206_v10 = vpack.c.bf16 %v810_v9, %v809_v8  ;;  %v811_v11 = vld [vmem:[%s1696_s2 + $0x30] sm:$0xff]  ;;  %v812_v12 = vld [vmem:[%s1696_s2 + $0x38] sm:$0xff]  ;;  %v813_v14 = vld [vmem:[%s1696_s2 + $0x40] sm:$0xff] }
  0x28   :  { %1096 = vmatmul.mubr.msk.f32.gmra.mrb[18].mxu0 %vm83_vm1, %v37_v35  ;;  %1143 = vmatprep.mubr.msk.f32.mxu1 %vm83_vm1, %v68_v38  ;;  %v1209_v13 = vpack.c.bf16 %v812_v12, %v811_v11  ;;  %v814_v15 = vld [vmem:[%s1696_s2 + $0x48] sm:$0xff]  ;;  %v815_v21 = vld [vmem:[%s1696_s2 + $0x50] sm:$0xff]  ;;  %v816_v22 = vld [vmem:[%s1696_s2 + $0x58] sm:$0xff]  ;;  %p1236_p3 = por %p1235_p2, %p1234_p1 }
  0x29   :  { %1098 = vmatprep.mubr.msk.f32.mxu0 %vm83_vm1, %v38_v36  ;;  %1201 = vmatpush3.bf16.msra.mxu1 %v1200_v4  ;;  %v1212_v16 = vpack.c.bf16 %v814_v15, %v813_v14  ;;  %v1215_v25 = vpack.c.bf16 %v816_v22, %v815_v21  ;;  %v817_v28 = vld [vmem:[%s1696_s2 + $0x60] sm:$0xff]  ;;  %v818_v29 = vld [vmem:[%s1696_s2 + $0x68] sm:$0xff] }
  0x2a   :  { %1202 = vmatprep.subr.bf16.mxu1 %v1253_v3  ;;  %v1218_v33 = vpack.c.bf16 %v818_v29, %v817_v28  ;;  %p1237_p4 = pnand %p1236_p3, %p1230_p0 }
  0x2b   :  { %1144 = vmatmul.mubr.msk.f32.gmra.mrb[16].mxu1 %vm83_vm1, %v69_v41 }
  0x2c   :  { %1099 = vmatmul.mubr.msk.f32.gmra.mrb[20].mxu0 %vm83_vm1, %v39_v39  ;;  %1146 = vmatprep.mubr.msk.f32.mxu1 %vm83_vm1, %v70_v42  ;;  %v819_v39 = vld [vmem:[%s1696_s2 + $0x70] sm:$0xff] }
  0x2d   :  { %1101 = vmatprep.mubr.msk.f32.mxu0 %vm83_vm1, %v40_v40  ;;  %1204 = vmatpush3.bf16.msra.mxu1 %v1203_v7  ;;  %v820_v40 = vld [vmem:[%s1696_s2 + $0x78] sm:$0xff] }
  0x2e   :  { %1205 = vmatprep.subr.bf16.mxu1 %v1253_v3 }
  0x2f   :  { %1147 = vmatmul.mubr.msk.f32.gmra.mrb[18].mxu1 %vm83_vm1, %v71_v45 }
  0x30   :  { %1102 = vmatmul.mubr.msk.f32.gmra.mrb[22].mxu0 %vm83_vm1, %v41_v43  ;;  %1149 = vmatprep.mubr.msk.f32.mxu1 %vm83_vm1, %v72_v46 }
  0x31   :  { %1104 = vmatprep.mubr.msk.f32.mxu0 %vm83_vm1, %v42_v44  ;;  %1207 = vmatpush3.bf16.msra.mxu1 %v1206_v10  ;;  %v1221_v44 = vpack.c.bf16 %v820_v40, %v819_v39 }
  0x32   :  { %1208 = vmatprep.subr.bf16.mxu1 %v1253_v3 }
  0x33   :  { %1150 = vmatmul.mubr.msk.f32.gmra.mrb[20].mxu1 %vm83_vm1, %v73_v49  ;;  %v1255_v49 = vmov 0.0  }
  0x34   :  { %1105 = vmatmul.mubr.msk.f32.gmra.mrb[24].mxu0 %vm83_vm1, %v43_v47  ;;  %1152 = vmatprep.mubr.msk.f32.mxu1 %vm83_vm1, %v74_v50 }
  0x35   :  { %1107 = vmatprep.mubr.msk.f32.mxu0 %vm83_vm1, %v44_v48  ;;  %1210 = vmatpush3.bf16.msra.mxu1 %v1209_v13 }
  0x36   :  { %1211 = vmatprep.subr.bf16.mxu1 %v1253_v3 }
  0x37   :  { %1153 = vmatmul.mubr.msk.f32.gmra.mrb[22].mxu1 %vm83_vm1, %v75_v53 }
  0x38   :  { %1108 = vmatmul.mubr.msk.f32.gmra.mrb[26].mxu0 %vm83_vm1, %v45_v51  ;;  %1155 = vmatprep.mubr.msk.f32.mxu1 %vm83_vm1, %v76_v54 }
  0x39   :  { %1110 = vmatprep.mubr.msk.f32.mxu0 %vm83_vm1, %v46_v52  ;;  %1213 = vmatpush3.bf16.msra.mxu1 %v1212_v16 }
  0x3a   :  { %1214 = vmatprep.subr.bf16.mxu1 %v1253_v3 }
  0x3b   :  { %1156 = vmatmul.mubr.msk.f32.gmra.mrb[24].mxu1 %vm83_vm1, %v77_v57 }
  0x3c   :  { %1111 = vmatmul.mubr.msk.f32.gmra.mrb[28].mxu0 %vm83_vm1, %v47_v55  ;;  %1158 = vmatprep.mubr.msk.f32.mxu1 %vm83_vm1, %v78_v58 }
  0x3d   :  { %1113 = vmatprep.mubr.msk.f32.mxu0 %vm83_vm1, %v48_v56  ;;  %1216 = vmatpush3.bf16.msra.mxu1 %v1215_v25 }
  0x3e   :  { %1217 = vmatprep.subr.bf16.mxu1 %v1253_v3 }
  0x3f   :  { %1159 = vmatmul.mubr.msk.f32.gmra.mrb[26].mxu1 %vm83_vm1, %v79_v61 }
  0x40   :  { %1114 = vmatmul.mubr.msk.f32.gmra.mrb[30].mxu0 %vm83_vm1, %v49_v59  ;;  %1161 = vmatprep.mubr.msk.f32.mxu1 %vm83_vm1, %v80_v62 }
  0x41   :  { %1116 = vmatprep.mubr.msk.f32.mxu0 %vm83_vm1, %v50_v60  ;;  %1219 = vmatpush3.bf16.msra.mxu1 %v1218_v33 }
  0x42   :  { %1220 = vmatprep.subr.bf16.mxu1 %v1253_v3 }
  0x43   :  { %1162 = vmatmul.mubr.msk.f32.gmra.mrb[28].mxu1 %vm83_vm1, %v81_v0 }
  0x44   :  { %1117 = vmatmul.mubr.msk.f32.gmra.mrb[32].mxu0 %vm83_vm1, %v51_v63  ;;  %1196 = vmatprep.mubr.msk.f32.mxu1 %vm1254_vm2, %v1255_v49 }
  0x45   :  { %1222 = vmatpush3.bf16.msra.mxu1 %v1221_v44 }
  0xd7   :  { %v1070_v17 = vpop.f32.mrb[0].mxu0 }
  0xd8   :  { %v666_v18 = vmax.f32 %v1070_v17, 0.0  ;;  %v346_v19 = vpop.f32.mrb[1].mxu0 }
  0xd9   :  { %v665_v20 = vmax.f32 %v346_v19, 0.0  ;;  %v1583_v37 = vpop.f32.mrb[0].mxu1 }
  0xda   :  { %v1585_v38 = vpop.f32.mrb[1].mxu1 }
  0xdb   :  { %v729_v23 = vadd.f32 %v666_v18, %v665_v20  ;;  %v1073_v24 = vpop.f32.mrb[2].mxu0 }
  0xdc   :  { %v356_v26 = vpop.f32.mrb[3].mxu0  ;;  %v668_v30 = vmax.f32 %v1073_v24, 0.0 }
  0xdd   :  { %v667_v27 = vmax.f32 %v356_v26, 0.0  ;;  %v1593_v48 = vpop.f32.mrb[2].mxu1 }
  0xde   :  { %v1595_v50 = vpop.f32.mrb[3].mxu1 }
  0xdf   :  { %v730_v31 = vadd.f32 %v729_v23, %v667_v27  ;;  %v1076_v32 = vpop.f32.mrb[4].mxu0 }
  0xe0   :  { %v366_v34 = vpop.f32.mrb[5].mxu0  ;;  %v670_v41 = vmax.f32 %v1076_v32, 0.0 }
  0xe1   :  { %v669_v35 = vmax.f32 %v366_v34, 0.0  ;;  %v731_v36 = vadd.f32 %v730_v31, %v668_v30  ;;  %v1597_v57 = vpop.f32.mrb[4].mxu1 }
  0xe2   :  { %v1599_v58 = vpop.f32.mrb[5].mxu1 }
  0xe3   :  { %v732_v42 = vadd.f32 %v731_v36, %v669_v35  ;;  %v1079_v43 = vpop.f32.mrb[6].mxu0 }
  0xe4   :  { %v376_v45 = vpop.f32.mrb[7].mxu0  ;;  %v672_v51 = vmax.f32 %v1079_v43, 0.0 }
  0xe5   :  { %v671_v46 = vmax.f32 %v376_v45, 0.0  ;;  %v733_v47 = vadd.f32 %v732_v42, %v670_v41 }
  0xe7   :  { %v734_v52 = vadd.f32 %v733_v47, %v671_v46  ;;  %v1082_v53 = vpop.f32.mrb[8].mxu0 }
  0xe8   :  { %v386_v54 = vpop.f32.mrb[9].mxu0  ;;  %v674_v59 = vmax.f32 %v1082_v53, 0.0 }
  0xe9   :  { %v673_v55 = vmax.f32 %v386_v54, 0.0  ;;  %v735_v56 = vadd.f32 %v734_v52, %v672_v51 }
  0xea   :  { %v1601_v1 = vpop.f32.mrb[6].mxu1 }
  0xeb   :  { %v736_v60 = vadd.f32 %v735_v56, %v673_v55  ;;  %v1085_v61 = vpop.f32.mrb[10].mxu0  ;;  %v1603_v2 = vpop.f32.mrb[7].mxu1 }
  0xec   :  { %v396_v62 = vpop.f32.mrb[11].mxu0  ;;  %v676_v3 = vmax.f32 %v1085_v61, 0.0 }
  0xed   :  { %v675_v63 = vmax.f32 %v396_v62, 0.0  ;;  %v737_v0 = vadd.f32 %v736_v60, %v674_v59 }
  0xee   :  { %v1605_v9 = vpop.f32.mrb[8].mxu1 }
  0xef   :  { %v738_v4 = vadd.f32 %v737_v0, %v675_v63  ;;  %v1088_v5 = vpop.f32.mrb[12].mxu0  ;;  %v1607_v10 = vpop.f32.mrb[9].mxu1 }
  0xf0   :  { %v406_v6 = vpop.f32.mrb[13].mxu0  ;;  %v678_v11 = vmax.f32 %v1088_v5, 0.0 }
  0xf1   :  { %v677_v7 = vmax.f32 %v406_v6, 0.0  ;;  %v739_v8 = vadd.f32 %v738_v4, %v676_v3 }
  0xf2   :  { %v1609_v17 = vpop.f32.mrb[10].mxu1 }
  0xf3   :  { %v740_v12 = vadd.f32 %v739_v8, %v677_v7  ;;  %v1091_v13 = vpop.f32.mrb[14].mxu0  ;;  %v1611_v18 = vpop.f32.mrb[11].mxu1 }
  0xf4   :  { %v416_v14 = vpop.f32.mrb[15].mxu0  ;;  %v680_v19 = vmax.f32 %v1091_v13, 0.0 }
  0xf5   :  { %v679_v15 = vmax.f32 %v416_v14, 0.0  ;;  %v741_v16 = vadd.f32 %v740_v12, %v678_v11 }
  0xf6   :  { %v1613_v25 = vpop.f32.mrb[12].mxu1 }
  0xf7   :  { %v742_v20 = vadd.f32 %v741_v16, %v679_v15  ;;  %v1094_v21 = vpop.f32.mrb[16].mxu0  ;;  %v1615_v26 = vpop.f32.mrb[13].mxu1 }
  0xf8   :  { %v426_v22 = vpop.f32.mrb[17].mxu0  ;;  %v682_v27 = vmax.f32 %v1094_v21, 0.0 }
  0xf9   :  { %v681_v23 = vmax.f32 %v426_v22, 0.0  ;;  %v743_v24 = vadd.f32 %v742_v20, %v680_v19 }
  0xfa   :  { %v1617_v33 = vpop.f32.mrb[14].mxu1 }
  0xfb   :  { %v744_v28 = vadd.f32 %v743_v24, %v681_v23  ;;  %v1097_v29 = vpop.f32.mrb[18].mxu0  ;;  %v1619_v34 = vpop.f32.mrb[15].mxu1 }
  0xfc   :  { %v436_v30 = vpop.f32.mrb[19].mxu0  ;;  %v684_v35 = vmax.f32 %v1097_v29, 0.0 }
  0xfd   :  { %v683_v31 = vmax.f32 %v436_v30, 0.0  ;;  %v745_v32 = vadd.f32 %v744_v28, %v682_v27 }
  0xfe   :  { %v1621_v43 = vpop.f32.mrb[16].mxu1 }
  0xff   :  { %v746_v36 = vadd.f32 %v745_v32, %v683_v31  ;;  %v1100_v39 = vpop.f32.mrb[20].mxu0  ;;  %v1623_v44 = vpop.f32.mrb[17].mxu1 }
 0x100   :  { %v446_v40 = vpop.f32.mrb[21].mxu0  ;;  %v686_v45 = vmax.f32 %v1100_v39, 0.0 }
 0x101   :  { %v685_v41 = vmax.f32 %v446_v40, 0.0  ;;  %v747_v42 = vadd.f32 %v746_v36, %v684_v35 }
 0x102   :  { %v1625_v53 = vpop.f32.mrb[18].mxu1 }
 0x103   :  { %v748_v46 = vadd.f32 %v747_v42, %v685_v41  ;;  %v1103_v47 = vpop.f32.mrb[22].mxu0  ;;  %v1627_v54 = vpop.f32.mrb[19].mxu1 }
 0x104   :  { %v456_v49 = vpop.f32.mrb[23].mxu0  ;;  %v688_v55 = vmax.f32 %v1103_v47, 0.0 }
 0x105   :  { %v687_v51 = vmax.f32 %v456_v49, 0.0  ;;  %v749_v52 = vadd.f32 %v748_v46, %v686_v45  ;;  %v699_v46 = vmax.f32 %v1585_v38, 0.0 }
 0x106   :  { %v1629_v63 = vpop.f32.mrb[20].mxu1 }
 0x107   :  { %v750_v56 = vadd.f32 %v749_v52, %v687_v51  ;;  %v1106_v59 = vpop.f32.mrb[24].mxu0  ;;  %v1631_v0 = vpop.f32.mrb[21].mxu1  ;;  %v700_v52 = vmax.f32 %v1583_v37, 0.0  ;;  %v707_v37 = vmax.f32 %v1607_v10, 0.0  ;;  %v714_v10 = vmax.f32 %v1617_v33, 0.0 }
 0x108   :  { %v466_v60 = vpop.f32.mrb[25].mxu0  ;;  %v690_v3 = vmax.f32 %v1106_v59, 0.0 }
 0x109   :  { %v689_v61 = vmax.f32 %v466_v60, 0.0  ;;  %v751_v62 = vadd.f32 %v750_v56, %v688_v55  ;;  %v701_v56 = vmax.f32 %v1595_v50, 0.0  ;;  %v702_v60 = vmax.f32 %v1593_v48, 0.0 }
 0x10a   :  { %v1633_v11 = vpop.f32.mrb[22].mxu1  ;;  %v708_v50 = vmax.f32 %v1605_v9, 0.0  ;;  %v709_v48 = vmax.f32 %v1611_v18, 0.0  ;;  %v715_v9 = vmax.f32 %v1623_v44, 0.0  ;;  %v716_v18 = vmax.f32 %v1621_v43, 0.0 }
 0x10b   :  { %v752_v4 = vadd.f32 %v751_v62, %v689_v61  ;;  %v1109_v5 = vpop.f32.mrb[26].mxu0  ;;  %v1635_v12 = vpop.f32.mrb[23].mxu1  ;;  %v703_v62 = vmax.f32 %v1599_v58, 0.0  ;;  %v710_v58 = vmax.f32 %v1609_v17, 0.0  ;;  %v717_v17 = vmax.f32 %v1627_v54, 0.0 }
 0x10c   :  { %v476_v6 = vpop.f32.mrb[27].mxu0  ;;  %v692_v13 = vmax.f32 %v1109_v5, 0.0  ;;  %v705_v5 = vmax.f32 %v1603_v2, 0.0  ;;  %v712_v2 = vmax.f32 %v1613_v25, 0.0  ;;  %v719_v25 = vmax.f32 %v1631_v0, 0.0 }
 0x10d   :  { %v691_v7 = vmax.f32 %v476_v6, 0.0  ;;  %v753_v8 = vadd.f32 %v752_v4, %v690_v3  ;;  %v704_v4 = vmax.f32 %v1597_v57, 0.0  ;;  %v711_v57 = vmax.f32 %v1615_v26, 0.0 }
 0x10e   :  { %v1637_v21 = vpop.f32.mrb[24].mxu1  ;;  %v718_v26 = vmax.f32 %v1625_v53, 0.0  ;;  %v721_v33 = vmax.f32 %v1635_v12, 0.0  ;;  %v722_v44 = vmax.f32 %v1633_v11, 0.0 }
 0x10f   :  { %v754_v14 = vadd.f32 %v753_v8, %v691_v7  ;;  %v1112_v15 = vpop.f32.mrb[28].mxu0  ;;  %v1639_v22 = vpop.f32.mrb[25].mxu1  ;;  %v706_v7 = vmax.f32 %v1601_v1, 0.0  ;;  %v713_v1 = vmax.f32 %v1619_v34, 0.0  ;;  %v720_v34 = vmax.f32 %v1629_v63, 0.0 }
 0x110   :  { %v486_v16 = vpop.f32.mrb[29].mxu0  ;;  %v694_v23 = vmax.f32 %v1112_v15, 0.0  ;;  %v723_v43 = vmax.f32 %v1639_v22, 0.0 }
 0x111   :  { %v693_v19 = vmax.f32 %v486_v16, 0.0  ;;  %v755_v20 = vadd.f32 %v754_v14, %v692_v13 }
 0x112   :  { %v1641_v31 = vpop.f32.mrb[26].mxu1 }
 0x113   :  { %v756_v24 = vadd.f32 %v755_v20, %v693_v19  ;;  %v1115_v27 = vpop.f32.mrb[30].mxu0  ;;  %v1643_v32 = vpop.f32.mrb[27].mxu1  ;;  %v726_v63 = vmax.f32 %v1641_v31, 0.0 }
 0x114   :  { %v496_v28 = vpop.f32.mrb[31].mxu0  ;;  %v696_v35 = vmax.f32 %v1115_v27, 0.0 }
 0x115   :  { %v695_v29 = vmax.f32 %v496_v28, 0.0  ;;  %v757_v30 = vadd.f32 %v756_v24, %v694_v23 }
 0x116   :  { %v1646_v47 = vpop.f32.mrb[28].mxu1 }
 0x117   :  { %v758_v36 = vadd.f32 %v757_v30, %v695_v29  ;;  %v1118_v39 = vpop.f32.mrb[32].mxu0  ;;  %v1648_v49 = vpop.f32.mrb[29].mxu1  ;;  %v728_v11 = vmax.f32 %v1646_v47, 0.0  ;;  %v983_v47 = vld [vmem:[%s1697_s3] ss:$0 sm:$0xff] }
 0x118   :  { %v698_v40 = vmax.f32 %v1118_v39, 0.0  ;;  %v506_v41 = vpop.f32.mrb[33].mxu0  ;;  %v727_v12 = vmax.f32 %v1648_v49, 0.0 }
 0x119   :  { %v759_v42 = vadd.f32 %v758_v36, %v696_v35  ;;  %v697_v45 = vmax.f32 %v506_v41, 0.0 }
 0x11b   :  { %v766_v51 = vadd.f32 %v698_v40, %v697_v45  ;;  %v760_v54 = vrot.slane %v759_v42, 4  ;;  %v724_v45 = vmax.f32 %v1637_v21, 0.0 }
 0x11d   :  { %v767_v55 = vadd.f32 %v766_v51, %v699_v46  ;;  %v725_v46 = vmax.f32 %v1643_v32, 0.0  ;;  %v761_v51 = vadd.f32 %v760_v54, %v759_v42 }
 0x11f   :  { %v768_v59 = vadd.f32 %v767_v55, %v700_v52 }
 0x121   :  { %v769_v61 = vadd.f32 %v768_v59, %v701_v56  ;;  %v762_v56 = vrot.slane %v761_v51, 2 }
 0x123   :  { %v770_v3 = vadd.f32 %v769_v61, %v702_v60  ;;  %v763_v60 = vadd.f32 %v762_v56, %v761_v51 }
 0x125   :  { %v771_v38 = vadd.f32 %v770_v3, %v703_v62  ;;  %v764_v21 = vrot.slane %v763_v60, 1 }
 0x127   :  { %v772_v6 = vadd.f32 %v771_v38, %v704_v4  ;;  %v765_v32 = vadd.f32 %v764_v21, %v763_v60 }
 0x129   :  { %v773_v8 = vadd.f32 %v772_v6, %v705_v5  ;;  %v803_v31 = vmul.f32 0.00390625, %v765_v32 }
 0x12b   :  { %v774_v13 = vadd.f32 %v773_v8, %v706_v7 }
 0x12d   :  { %v775_v14 = vadd.f32 %v774_v13, %v707_v37 }
 0x12f   :  { %v776_v15 = vadd.f32 %v775_v14, %v708_v50 }
 0x131   :  { %v777_v16 = vadd.f32 %v776_v15, %v709_v48 }
 0x133   :  { %v778_v19 = vadd.f32 %v777_v16, %v710_v58 }
 0x135   :  { %v779_v20 = vadd.f32 %v778_v19, %v711_v57 }
 0x137   :  { %v780_v23 = vadd.f32 %v779_v20, %v712_v2 }
 0x139   :  { %v781_v24 = vadd.f32 %v780_v23, %v713_v1 }
 0x13b   :  { %v782_v27 = vadd.f32 %v781_v24, %v714_v10 }
 0x13d   :  { %v783_v28 = vadd.f32 %v782_v27, %v715_v9 }
 0x13f   :  { %v784_v29 = vadd.f32 %v783_v28, %v716_v18 }
 0x141   :  { %v785_v30 = vadd.f32 %v784_v29, %v717_v17 }
 0x143   :  { %v786_v35 = vadd.f32 %v785_v30, %v718_v26 }
 0x145   :  { %v787_v36 = vadd.f32 %v786_v35, %v719_v25 }
 0x147   :  { %v788_v39 = vadd.f32 %v787_v36, %v720_v34 }
 0x149   :  { %v789_v40 = vadd.f32 %v788_v39, %v721_v33 }
 0x14b   :  { %v790_v41 = vadd.f32 %v789_v40, %v722_v44 }
 0x14d   :  { %v791_v53 = vadd.f32 %v790_v41, %v723_v43 }
 0x14f   :  { %v792_v0 = vadd.f32 %v791_v53, %v724_v45 }
 0x151   :  { %v793_v52 = vadd.f32 %v792_v0, %v725_v46 }
 0x153   :  { %v794_v55 = vadd.f32 %v793_v52, %v726_v63 }
 0x155   :  { %v795_v59 = vadd.f32 %v794_v55, %v727_v12 }
 0x157   :  { %v796_v22 = vadd.f32 %v795_v59, %v728_v11 }
 0x159   :  { %v797_v61 = vrot.slane %v796_v22, 4 }
 0x15b   :  { %v798_v62 = vadd.f32 %v797_v61, %v796_v22 }
 0x15d   :  { %v799_v3 = vrot.slane %v798_v62, 2 }
 0x15f   :  { %v800_v4 = vadd.f32 %v799_v3, %v798_v62 }
 0x161   :  { %v801_v38 = vrot.slane %v800_v4, 1 }
 0x163   :  { %v802_v42 = vadd.f32 %v801_v38, %v800_v4 }
 0x165   :  { %v804_v5 = vmul.f32 0.00390625, %v802_v42 }
 0x167   :  { %v831_v6 = vsel %vm830_vm3, %v804_v5, %v803_v31 }
 0x168   :  { %1197 = vmatmul.mubr.f32.vlgmr.msra.gmra.mrb[30].mxu1 %v831_v6 }
 0x23b   :  { %v899_v49 = vpop.f32.mrb[30].mxu1 }
 0x23c   :  { %v900_v7 = vadd.f32 %v983_v47, %v899_v49  ;;  %v1198_v8 = vpop.f32.mrb[31].mxu1 }
 0x23e   :  { %903 = vst [vmem:[#allocation2] sm:$0x3] %v900_v7 }
 0x23f   :  { %1240 = shalt.err (!%p1237_p4)
}
 0x240   :  { %s1241_s19 = scalar_lea.hbm %s1698_s4, 32 }
 0x241   :  { %p1242_p5 = scmp.ne.s32.totalorder %s1698_s4, %s1241_s19  ;;  %p1245_p6 = scmp.lt.u32.totalorder %s1241_s19, %s1698_s4 }
 0x243   :  { %p1247_p7 = pnand %p1245_p6, %p1242_p5 }
 0x245   :  { %1250 = shalt.err (!%p1247_p7)
}
 0x246   :  { %913 = dma.vmem_to_hbm [thread:$0]  %s911_s0, 32, %s1698_s4, [#allocation3]  }
 0x247   :  { %1251 = dma.done.wait [#allocation3], 32  }
 0x248   :  { %1252 = vsyncadd [#allocation3], 4294967264 }
 0x249   :  { %917 = vsyncpa [#allocation3], 1 }

</bundles_post_ra>
